<compile_context>
chip_gen: v5e
topology: v5e:2x2
jax: 0.10.0
libtpu: 0.0.40
codegen_flags: <defaults>
</compile_context>

<pallas_src>
from typing import NamedTuple

import jax
import jax.numpy as jnp
from jax import lax
from jax.experimental import pallas as pl
from jax.experimental.pallas import tpu as pltpu


# --------------------------------------------------------------------------
# Per-generation VMEM budgeting
# --------------------------------------------------------------------------
class _VmemBudget(NamedTuple):
    fused_vmem_limit: int   # vmem_limit_bytes for the fused single-pass call
    tiled_vmem_limit: int   # vmem_limit_bytes for the two-pass calls
    tile_target_bytes: int  # target bytes per (row_tile, lane_tile) block


def _vmem_budget():
    phys = None
    try:
        info = pltpu.get_tpu_info()
        for attr in ("vmem_capacity_bytes", "vmem_bytes"):
            phys = getattr(info, attr, None)
            if phys:
                break
    except Exception:
        phys = None
    if not phys:
        phys = 64 * 1024 * 1024  # conservative default: assume v7x-sized VMEM

    # Fused path keeps the in + out slabs double-buffered (~4 slabs) resident.
    fused_vmem = min((phys * 3) // 4, 112 * 1024 * 1024)
    # Two-pass path: ~4 MiB tiles on 128-MiB parts, ~2 MiB on 64-MiB parts.
    tiled_vmem = min(phys // 2, 64 * 1024 * 1024)
    tile_target = max(1 << 20, tiled_vmem // 16)
    return _VmemBudget(int(fused_vmem), int(tiled_vmem), int(tile_target))


def _sublane_base(itemsize):
    return {4: 8, 2: 16, 1: 32}.get(int(itemsize), 8)


def _choose_tiles(nc, hw, itemsize, target_bytes):
    """(row_tile, lane_tile) for a (nc, hw) array: lane tile is a multiple of
    128 (or full HW), row tile a multiple of the sublane base (or full NC),
    sized so one block is ~target_bytes."""
    base = _sublane_base(itemsize)
    if hw <= 128:
        t = hw
    else:
        # Lane tile: multiple of 128, no larger than HW, capped so that even a
        # single base-row strip stays within the target block size.
        t_cap = max(128, (target_bytes // (base * itemsize)) // 128 * 128)
        t = min((hw // 128) * 128, t_cap, 32768)
        t = max(t, 128)
    r = max(base, (target_bytes // max(1, t * itemsize)) // base * base)
    if r >= nc:
        r = nc
    return int(r), int(t)


# --------------------------------------------------------------------------
# Fused single-pass path: pool + excitation + scale in one kernel
# --------------------------------------------------------------------------
def _se_fused(x, w1, b1, w2, b2, budget):
    N, C, H, W = x.shape
    Cse = w1.shape[0]
    HW = H * W

    x_r = x.reshape(N, C, HW)                      # free reshape, no transpose
    w1t = w1.astype(jnp.float32).T                 # (C, Cse)
    w2f = w2.astype(jnp.float32)                   # (C, Cse)
    b1f = b1.astype(jnp.float32).reshape(1, Cse)
    b2f = b2.astype(jnp.float32).reshape(C, 1)
    inv_hw = float(1.0 / HW)

    def kernel(x_ref, w1t_ref, b1_ref, w2_ref, b2_ref, o_ref):
        xb = x_ref[0]                                                 # (C, HW)
        # Global average pool: f32 lane-axis reduce over the whole slab.
        pooled = jnp.sum(xb, axis=1, keepdims=True,
                         dtype=jnp.float32) * inv_hw                  # (C, 1)
        # Excitation as broadcast-mul + reduce (tiny; no matmul/transpose).
        h = jnp.sum(w1t_ref[...] * pooled, axis=0,
                    keepdims=True) + b1_ref[...]                      # (1, Cse)
        h = h * jax.nn.sigmoid(h)                                     # swish
        s = jax.nn.sigmoid(jnp.sum(w2_ref[...] * h, axis=1,
                                   keepdims=True) + b2_ref[...])      # (C, 1)
        # Scale in the input dtype; gate broadcasts along the lane (HW) axis.
        o_ref[0] = xb * s.astype(o_ref.dtype)

    out = pl.pallas_call(
        kernel,
        out_shape=jax.ShapeDtypeStruct((N, C, HW), x.dtype),
        grid_spec=pltpu.PrefetchScalarGridSpec(
            num_scalar_prefetch=0,
            grid=(N,),
            in_specs=[
                pl.BlockSpec((1, C, HW), lambda n: (n, 0, 0)),   # x slab
                pl.BlockSpec((C, Cse), lambda n: (0, 0)),        # w1^T
                pl.BlockSpec((1, Cse), lambda n: (0, 0)),        # b1
                pl.BlockSpec((C, Cse), lambda n: (0, 0)),        # w2
                pl.BlockSpec((C, 1), lambda n: (0, 0)),          # b2
            ],
            out_specs=pl.BlockSpec((1, C, HW), lambda n: (n, 0, 0)),
        ),
        compiler_params=pltpu.CompilerParams(
            dimension_semantics=("parallel",),
            vmem_limit_bytes=budget.fused_vmem_limit),
    )(x_r, w1t, b1f, w2f, b2f)

    return out.reshape(N, C, H, W)


# --------------------------------------------------------------------------
# Streaming two-pass fallback (flattened N*C rows)
# --------------------------------------------------------------------------
def _make_pool_kernel(hw, tile_hw, n_hw):
    """Streaming per-row sum over lane tiles, accumulated in f32 into the
    resident (R, 1) output block (reduction axis is the last grid axis)."""
    mask_needed = (hw % tile_hw) != 0

    def _pool_kernel(x_ref, sum_ref):
        t = pl.program_id(1)

        @pl.when(t == 0)
        def _():
            sum_ref[...] = jnp.zeros_like(sum_ref)

        xb = x_ref[...]                                        # (R, tile_hw)

        if mask_needed:
            # Only the last HW tile is partial -> mask only there.
            @pl.when(t == n_hw - 1)
            def _masked():
                col = t * tile_hw + lax.broadcasted_iota(jnp.int32, xb.shape, 1)
                xm = jnp.where(col < hw, xb, jnp.zeros_like(xb))
                sum_ref[...] += jnp.sum(xm, axis=1, keepdims=True,
                                        dtype=jnp.float32)

            @pl.when(t < n_hw - 1)
            def _fast():
                sum_ref[...] += jnp.sum(xb, axis=1, keepdims=True,
                                        dtype=jnp.float32)
        else:
            sum_ref[...] += jnp.sum(xb, axis=1, keepdims=True,
                                    dtype=jnp.float32)

    return _pool_kernel


def _scale_kernel(s_ref, x_ref, o_ref):
    # s_ref: (R, 1) gate (already in x's dtype); x_ref/o_ref: (R, tile_hw).
    # Gate broadcasts along the lane (HW) axis; multiply runs in input dtype.
    o_ref[...] = x_ref[...] * s_ref[...]


def _se_two_pass(x, w1, b1, w2, b2, budget):
    N, C, H, W = x.shape
    HW = H * W
    NC = N * C
    itemsize = x.dtype.itemsize

    x_r = x.reshape(NC, HW)                        # free reshape, no transpose
    R, T = _choose_tiles(NC, HW, itemsize, budget.tile_target_bytes)
    n_rows = pl.cdiv(NC, R)
    n_hw = pl.cdiv(HW, T)

    # ---- Pass 1: streaming global-average-pool (per-row sums over HW) ------
    pooled_sum = pl.pallas_call(
        _make_pool_kernel(HW, T, n_hw),
        out_shape=jax.ShapeDtypeStruct((NC, 1), jnp.float32),
        grid_spec=pltpu.PrefetchScalarGridSpec(
            num_scalar_prefetch=0,
            grid=(n_rows, n_hw),
            in_specs=[pl.BlockSpec((R, T), lambda r, t: (r, t))],
            out_specs=pl.BlockSpec((R, 1), lambda r, t: (r, 0)),
        ),
        compiler_params=pltpu.CompilerParams(
            dimension_semantics=("parallel", "arbitrary"),
            vmem_limit_bytes=budget.tiled_vmem_limit),
    )(x_r)

    # ---- Excitation: tiny batched matmuls over all N at once (plain XLA) ---
    pooled = pooled_sum.reshape(N, C) / jnp.float32(HW)                 # (N, C)
    w1f = w1.astype(jnp.float32)
    w2f = w2.astype(jnp.float32)
    h = pooled @ w1f.T + b1.astype(jnp.float32)                         # (N, Cse)
    h = h * jax.nn.sigmoid(h)                                           # swish
    s = jax.nn.sigmoid(h @ w2f.T + b2.astype(jnp.float32))              # (N, C)
    s = s.astype(x.dtype).reshape(NC, 1)

    # ---- Pass 2: streaming scale, fully parallel grid (both TCs on v7x) ----
    out = pl.pallas_call(
        _scale_kernel,
        out_shape=jax.ShapeDtypeStruct((NC, HW), x.dtype),
        grid_spec=pltpu.PrefetchScalarGridSpec(
            num_scalar_prefetch=0,
            grid=(n_rows, n_hw),
            in_specs=[
                pl.BlockSpec((R, 1), lambda r, t: (r, 0)),    # gate
                pl.BlockSpec((R, T), lambda r, t: (r, t)),    # x tile
            ],
            out_specs=pl.BlockSpec((R, T), lambda r, t: (r, t)),
        ),
        compiler_params=pltpu.CompilerParams(
            dimension_semantics=("parallel", "parallel"),
            vmem_limit_bytes=budget.tiled_vmem_limit),
    )(s, x_r)

    return out.reshape(N, C, H, W)


# --------------------------------------------------------------------------
# Public entry point
# --------------------------------------------------------------------------
def se_forward(x, w1, b1, w2, b2):
    """SE block forward. x: (N, C, H, W). w1: (Cse, C), b1: (Cse,),
    w2: (C, Cse), b2: (C,). Returns (N, C, H, W)."""
    N, C, H, W = x.shape
    HW = H * W
    itemsize = x.dtype.itemsize
    budget = _vmem_budget()

    # Fused path needs ~4x slab (in + out, double-buffered); leave extra margin
    # for the f32 widening of sub-f32 inputs during the in-kernel pool reduce.
    denom = 4 if itemsize >= 4 else 6
    slab_limit = max(0, budget.fused_vmem_limit // denom - (2 << 20))
    slab_bytes = C * HW * itemsize

    if slab_bytes <= slab_limit:
        return _se_fused(x, w1, b1, w2, b2, budget)
    return _se_two_pass(x, w1, b1, w2, b2, budget)


def _se_reference(x, w1, b1, w2, b2):
    # Pure-JAX reference mirroring the PyTorch module.
    pooled = jnp.mean(x, axis=(2, 3))                                   # (N, C)
    h = pooled @ w1.T + b1                                              # (N, Cse)
    h = h * jax.nn.sigmoid(h)
    s = jax.nn.sigmoid(h @ w2.T + b2)                                   # (N, C)
    return x * s[:, :, None, None]


if __name__ == "__main__":
    N, C, Cse, H, W = 2, 4, 2, 16, 16
    key = jax.random.PRNGKey(0)
    kx, k1, kb1, k2, kb2 = jax.random.split(key, 5)

    x = jax.random.normal(kx, (N, C, H, W), dtype=jnp.float32)
    # Parameter shapes from nn.Conv2d(C, Cse, 1) / nn.Conv2d(Cse, C, 1), squeezed.
    w1 = jax.random.normal(k1, (Cse, C), dtype=jnp.float32) * 0.1
    b1 = jax.random.normal(kb1, (Cse,), dtype=jnp.float32) * 0.1
    w2 = jax.random.normal(k2, (C, Cse), dtype=jnp.float32) * 0.1
    b2 = jax.random.normal(kb2, (C,), dtype=jnp.float32) * 0.1

    ref = _se_reference(x, w1, b1, w2, b2)

    # Main entry point: small slab -> fused single-pass path.
    out = jax.block_until_ready(se_forward(x, w1, b1, w2, b2))
    assert out.shape == (N, C, H, W)
    assert jnp.allclose(out, ref, atol=1e-5, rtol=1e-5)

    # Also exercise the streaming two-pass fallback with a tiny forced tile
    # budget (multiple HW tiles, resident accumulator).
    budget_small = _VmemBudget(
        fused_vmem_limit=32 * 1024 * 1024,
        tiled_vmem_limit=32 * 1024 * 1024,
        tile_target_bytes=8 * 128 * 4,
    )
    out2 = jax.block_until_ready(_se_two_pass(x, w1, b1, w2, b2, budget_small))
    assert jnp.allclose(out2, ref, atol=1e-5, rtol=1e-5)

    # And the partial-last-tile masking path (HW not a multiple of 128).
    H2 = W2 = 15
    x2 = jax.random.normal(kx, (N, C, H2, W2), dtype=jnp.float32)
    ref2 = _se_reference(x2, w1, b1, w2, b2)
    out3 = jax.block_until_ready(_se_two_pass(x2, w1, b1, w2, b2, budget_small))
    assert out3.shape == (N, C, H2, W2)
    assert jnp.allclose(out3, ref2, atol=1e-5, rtol=1e-5)

    print("KERNEL_OK")
</pallas_src>

<mosaic_0001>
module attributes {stable_mosaic.version = 11 : i64} {
  func.func @kernel(%arg0: i32, %arg1: memref<1x4x256xf32, #tpu.memory_space<vmem>>, %arg2: memref<4x2xf32, #tpu.memory_space<vmem>>, %arg3: memref<1x2xf32, #tpu.memory_space<vmem>>, %arg4: memref<4x2xf32, #tpu.memory_space<vmem>>, %arg5: memref<4x1xf32, #tpu.memory_space<vmem>>, %arg6: memref<1x4x256xf32, #tpu.memory_space<vmem>>) attributes {dimension_semantics = [#tpu.dimension_semantics<parallel>], iteration_bounds = array<i64: 2>, scalar_prefetch = 0 : i64, scratch_operands = 0 : i64, tpu.core_type = #tpu.core_type<tc>, window_params = [{transform_indices = @transform_0, window_bounds = array<i64: 1, 4, 256>}, {pipeline_mode = #tpu.pipeline_mode<synchronous>, transform_indices = @transform_1, window_bounds = array<i64: 4, 2>}, {pipeline_mode = #tpu.pipeline_mode<synchronous>, transform_indices = @transform_2, window_bounds = array<i64: 1, 2>}, {pipeline_mode = #tpu.pipeline_mode<synchronous>, transform_indices = @transform_3, window_bounds = array<i64: 4, 2>}, {pipeline_mode = #tpu.pipeline_mode<synchronous>, transform_indices = @transform_4, window_bounds = array<i64: 4, 1>}, {transform_indices = @transform_5, window_bounds = array<i64: 1, 4, 256>}]} {
    %c0 = arith.constant 0 : index
    %c0_0 = arith.constant 0 : index
    %c0_1 = arith.constant 0 : index
    %0 = vector.load %arg1[%c0, %c0_0, %c0_1] : memref<1x4x256xf32, #tpu.memory_space<vmem>>, vector<1x4x256xf32>
    %1 = vector.shape_cast %0 : vector<1x4x256xf32> to vector<4x256xf32>
    %cst = arith.constant dense<0.000000e+00> : vector<4xf32>
    %2 = vector.multi_reduction <add>, %1, %cst [1] : vector<4x256xf32> to vector<4xf32>
    %3 = vector.shape_cast %2 : vector<4xf32> to vector<4x1xf32>
    %cst_2 = arith.constant 3.906250e-03 : f32
    %4 = vector.broadcast %cst_2 : f32 to vector<4x1xf32>
    %5 = arith.mulf %3, %4 : vector<4x1xf32>
    %c0_3 = arith.constant 0 : index
    %c0_4 = arith.constant 0 : index
    %6 = vector.load %arg2[%c0_3, %c0_4] : memref<4x2xf32, #tpu.memory_space<vmem>>, vector<4x2xf32>
    %7 = vector.broadcast %5 : vector<4x1xf32> to vector<4x2xf32>
    %8 = arith.mulf %6, %7 : vector<4x2xf32>
    %cst_5 = arith.constant dense<0.000000e+00> : vector<2xf32>
    %9 = vector.multi_reduction <add>, %8, %cst_5 [0] : vector<4x2xf32> to vector<2xf32>
    %10 = vector.shape_cast %9 : vector<2xf32> to vector<1x2xf32>
    %c0_6 = arith.constant 0 : index
    %c0_7 = arith.constant 0 : index
    %11 = vector.load %arg3[%c0_6, %c0_7] : memref<1x2xf32, #tpu.memory_space<vmem>>, vector<1x2xf32>
    %12 = arith.addf %10, %11 : vector<1x2xf32>
    %13 = arith.negf %12 : vector<1x2xf32>
    %14 = math.exp %13 : vector<1x2xf32>
    %cst_8 = arith.constant 1.000000e+00 : f32
    %15 = vector.broadcast %cst_8 : f32 to vector<1x2xf32>
    %16 = arith.addf %15, %14 : vector<1x2xf32>
    %17 = arith.divf %15, %16 : vector<1x2xf32>
    %18 = arith.mulf %12, %17 : vector<1x2xf32>
    %c0_9 = arith.constant 0 : index
    %c0_10 = arith.constant 0 : index
    %19 = vector.load %arg4[%c0_9, %c0_10] : memref<4x2xf32, #tpu.memory_space<vmem>>, vector<4x2xf32>
    %20 = vector.broadcast %18 : vector<1x2xf32> to vector<4x2xf32>
    %21 = arith.mulf %19, %20 : vector<4x2xf32>
    %cst_11 = arith.constant dense<0.000000e+00> : vector<4xf32>
    %22 = vector.multi_reduction <add>, %21, %cst_11 [1] : vector<4x2xf32> to vector<4xf32>
    %23 = vector.shape_cast %22 : vector<4xf32> to vector<4x1xf32>
    %c0_12 = arith.constant 0 : index
    %c0_13 = arith.constant 0 : index
    %24 = vector.load %arg5[%c0_12, %c0_13] : memref<4x1xf32, #tpu.memory_space<vmem>>, vector<4x1xf32>
    %25 = arith.addf %23, %24 : vector<4x1xf32>
    %26 = arith.negf %25 : vector<4x1xf32>
    %27 = math.exp %26 : vector<4x1xf32>
    %cst_14 = arith.constant 1.000000e+00 : f32
    %28 = vector.broadcast %cst_14 : f32 to vector<4x1xf32>
    %29 = arith.addf %28, %27 : vector<4x1xf32>
    %30 = arith.divf %28, %29 : vector<4x1xf32>
    %31 = vector.broadcast %30 : vector<4x1xf32> to vector<4x256xf32>
    %32 = arith.mulf %1, %31 : vector<4x256xf32>
    %c0_15 = arith.constant 0 : index
    %c0_16 = arith.constant 0 : index
    %c0_17 = arith.constant 0 : index
    %33 = vector.load %arg6[%c0_15, %c0_16, %c0_17] : memref<1x4x256xf32, #tpu.memory_space<vmem>>, vector<1x4x256xf32>
    %34 = vector.shape_cast %33 : vector<1x4x256xf32> to vector<4x256xf32>
    %35 = vector.shape_cast %32 : vector<4x256xf32> to vector<1x4x256xf32>
    tpu.vector_store %arg6[%c0_15, %c0_16, %c0_17], %35 {strides = array<i32>} : memref<1x4x256xf32, #tpu.memory_space<vmem>>, vector<1x4x256xf32>,
    return
  }
  func.func @transform_0(%arg0: i32) -> (i32, i32, i32) {
    %c0_i32 = arith.constant 0 : i32
    %c0_i32_0 = arith.constant 0 : i32
    %c0_i32_1 = arith.constant 0 : i32
    return %arg0, %c0_i32, %c0_i32_0 : i32, i32, i32
  }
  func.func @transform_1(%arg0: i32) -> (i32, i32) {
    %c0_i32 = arith.constant 0 : i32
    %c0_i32_0 = arith.constant 0 : i32
    %c0_i32_1 = arith.constant 0 : i32
    return %c0_i32, %c0_i32_0 : i32, i32
  }
  func.func @transform_2(%arg0: i32) -> (i32, i32) {
    %c0_i32 = arith.constant 0 : i32
    %c0_i32_0 = arith.constant 0 : i32
    %c0_i32_1 = arith.constant 0 : i32
    return %c0_i32, %c0_i32_0 : i32, i32
  }
  func.func @transform_3(%arg0: i32) -> (i32, i32) {
    %c0_i32 = arith.constant 0 : i32
    %c0_i32_0 = arith.constant 0 : i32
    %c0_i32_1 = arith.constant 0 : i32
    return %c0_i32, %c0_i32_0 : i32, i32
  }
  func.func @transform_4(%arg0: i32) -> (i32, i32) {
    %c0_i32 = arith.constant 0 : i32
    %c0_i32_0 = arith.constant 0 : i32
    %c0_i32_1 = arith.constant 0 : i32
    return %c0_i32, %c0_i32_0 : i32, i32
  }
  func.func @transform_5(%arg0: i32) -> (i32, i32, i32) {
    %c0_i32 = arith.constant 0 : i32
    %c0_i32_0 = arith.constant 0 : i32
    %c0_i32_1 = arith.constant 0 : i32
    return %arg0, %c0_i32, %c0_i32_0 : i32, i32, i32
  }
}

</mosaic_0001>

<bundles_post_ra>
// kernel: tpu_custom_call.1
= control target key start
LH: loop header
LB: loop body
LE: loop exit
PB: predicated region body
PF: predicated region fallthrough
CT: control target
= control target key end

     0   :  { %10 = vsyncpa [#allocation3], 0  ;;  %s769_s0 = inlined_call_operand.hbm [shape: f32[2,4,256], index: 0, kind: input, shape index: {}]   ;;  %s770_s1 = inlined_call_operand.vmem [shape: f32[4,2], index: 1, kind: input, shape index: {}]   ;;  %s771_s2 = inlined_call_operand.vmem [shape: f32[1,2], index: 2, kind: input, shape index: {}]   ;;  %s772_s3 = inlined_call_operand.vmem [shape: f32[4,2], index: 3, kind: input, shape index: {}]   ;;  %s773_s4 = inlined_call_operand.vmem [shape: f32[4,1], index: 4, kind: input, shape index: {}]   ;;  %s774_s5 = inlined_call_operand.hbm [shape: f32[2,4,256], index: 5, kind: output, shape index: {}]  }
   0x1   :  { %12 = vsyncpa [#allocation3 + $0x1], 0 }
   0x2   :  { %13 = vsyncpa [#allocation4], 0 }
   0x3   :  { %15 = vsyncpa [#allocation4 + $0x1], 0  ;;  %s620_s18 = smov 0   ;;  %s622_s19 = smov 0  }
   0x4   :  { %s624_s20 = smov 0   ;;  %s626_s21 = smov 0  }
   0x5 LB: > { %s641_s22 = sadd.s32 4294967295, %s586_s21   ;;  %s414_s23 = sadd.s32 4294967294, %s586_s21   ;;  %s586_s21 = sphi %s626_s21, %s784_s21   ;;  %s582_s20 = sphi %s624_s20, %s783_s20   ;;  %s578_s19 = sphi %s622_s19, %s782_s19   ;;  %s574_s18 = sphi %s620_s18, %s781_s18  }
   0x6   : > { %s645_s24 = sadd.s32 1, %s586_s21   ;;  %s28_s25 = sadd.s32 1, %s582_s20 }
   0x7   : > { %s25_s26 = ssub.s32 %s586_s21, %s645_s24  ;;  %p35_p0 = scmp.ne.s32.totalorder %s582_s20, %s578_s19 }
   0x8   : > { %p26_p1 = scmp.eq.s32.totalorder %s25_s26, 0  ;;  %p36_p2 = scmp.eq.s32.totalorder %s586_s21, 0 }
   0x9   : > { %p41_p3 = scmp.ne.s32.totalorder %s578_s19, %s574_s18  ;;  %p42_p4 = scmp.eq.s32.totalorder %s641_s22, 0 }
   0xa   : > { %s657_s27 = scalar_select %p26_p1, %s582_s20, %s28_s25  }
   0xb   : > { %p659_p5 = por %p36_p2, %p35_p0  ;;  %p663_p6 = por %p42_p4, %p41_p3 }
   0xc   : > { %p149_p7 = scmp.eq.s32.totalorder %s641_s22, 1  ;;  %p155_p8 = scmp.eq.s32.totalorder %s414_s23, 1 }
   0xd   : > { %p444_p10 = scmp.lt.s32.totalorder %s586_s21, 2  ;;  %s187_s7 = sand.u32 1, %s582_s20  }
   0xe   : > { %p670_p11 = por %p149_p7, %p35_p0  ;;  %p674_p12 = por %p155_p8, %p41_p3 }
   0xf   : > { %s430_s8 = sshll.u32 %s586_s21, 3  ;;  %s417_s9 = sshll.u32 %s187_s7, 3 }
  0x10   : > { %s196_s12 = scalar_lea.hbm %s769_s0, %s430_s8  ;;  %s191_s14 = scalar_lea.vmem [#allocation2], %s417_s9 }
  0x11   : > { %s198_s13 = sshll.u32 %s196_s12, 4  ;;  %s200_s15 = sshll.u32 %s191_s14, 4  ;;  %s199_s13 = int_to_ptr.hbm [resolvable:$true] %s198_s13  ;;  %s201_s15 = int_to_ptr.vmem [resolvable:$true] %s200_s15 }
  0x12   : > { %p685_p13 = pnand %p444_p10, %p659_p5  ;;  %p420_p0 = scmp.ge.s32.totalorder %s586_s21, 1 }
  0x13   : > { %p205_p1 = scmp.lt.s32.totalorder %s586_s21, 3  ;;  %s188_s17 = scalar_lea.sflag [#allocation3], %s187_s7 }
  0x14   : > { %s490_s23 = sshra.s32 %s199_s13, 4  ;;  %p494_p3 = pneg %p685_p13  ;;  %s491_s23 = int_to_ptr.hbm [resolvable:$true] %s490_s23 }
  0x15   : > { %s492_s25 = scalar_lea.hbm %s491_s23, 8  ;;  %s497_s28 = scalar_lea.hbm %s769_s0, 16 }
  0x16   : > { %p493_p2 = scmp.ne.s32.totalorder %s491_s23, %s492_s25  ;;  %p498_p5 = scmp.lt.s32.totalorder %s491_s23, %s769_s0 }
  0x17   : > { %p499_p8 = scmp.lt.s32.totalorder %s497_s28, %s492_s25 }
  0x18   : > { %p495_p4 = pnand %p494_p3, %p493_p2 }
  0x19   : > { %p500_p10 = por %p499_p8, %p498_p5 }
  0x1a   : > { %p496_p7 = pneg %p495_p4 }
  0x1c   : > { %p501_p9 = pnand %p500_p10, %p496_p7 }
  0x1e   : > { %504 = shalt.err (!%p501_p9)
}
  0x1f   : > { %439 = dma.hbm_to_vmem [thread:$0]  (!%p685_p13), %s199_s13, 128, %s201_s15, %s188_s17  }
  0x20   : > { %p206_p2 = pnand %p420_p0, %p205_p1 }
  0x21   : > { %s706_s7 = sand.u32 (!%p206_p2), 1, %s578_s19  }
  0x22   : > { %209 = sbr.rel (%p206_p2) target bundleno = 490 (0x1ea), region = 40  ;;  %s421_s11 = sshll.u32 (!%p206_p2), %s706_s7, 3 }
  0x23   : > { %s212_s12 = scalar_lea.sflag (!%p206_p2), [#allocation3], %s706_s7  ;;  %s215_s14 = scalar_lea.vmem (!%p206_p2), [#allocation2], %s421_s11 }
  0x27   : > { %565 = dma.done.wait (%p663_p6), %s212_s12, 128  }
  0x28   : > { %567 = vsyncadd (%p663_p6), %s212_s12, 4294967168  ;;  %v716_v0 = vld [vmem:[%s215_s14] sm:$0xff]  ;;  %vm250_vm0 = vcmask 1043456   ;;  %v257_v6 = vld [vmem:[%s770_s1] sm:$0xf]  ;;  %vm259_vm1 = vcmask 11264  }
  0x29   : > { %245 = vst [vmem:[#allocation1] ss:$2 sm:$0xff] %v716_v0  ;;  %v267_v16 = vld [vmem:[%s771_s2] sm:$0x1]  ;;  %v588_v37 = vmov 0   ;;  %s431_s8 = sshll.u32 %s641_s22, 3 }
  0x2a   : > { %v289_v33 = vld [vmem:[%s772_s3] sm:$0xf]  ;;  %480 = vset.pattern.permute.xlu1 %v588_v37  ;;  %481 = vset.pattern.permute.xlu0 %v588_v37  ;;  %v589_v54 = vmov 839922192   ;;  %s339_s10 = scalar_lea.hbm %s774_s5, %s431_s8  ;;  %s242_s12 = scalar_lea.vmem [#allocation5], %s421_s11 }
  0x2b   : > { %v295_v38 = vld [vmem:[%s773_s4] sm:$0xf]  ;;  %v321_v55 = vunpack.c.l.s4 %v589_v54  ;;  %s341_s14 = sshll.u32 %s242_s12, 4  ;;  %s343_s13 = sshll.u32 %s339_s10, 4  ;;  %s342_s14 = int_to_ptr.vmem [resolvable:$true] %s341_s14  ;;  %s344_s13 = int_to_ptr.hbm [resolvable:$true] %s343_s13 }
  0x2c   : > { %s328_s15 = scalar_lea.sflag [#allocation4], %s706_s7  ;;  %s534_s29 = sshra.s32 %s344_s13, 4  ;;  %s535_s29 = int_to_ptr.hbm [resolvable:$true] %s534_s29 }
  0x2d   : > { %v322_v56 = vunpack.c.0.s8 %v321_v55  ;;  %s536_s22 = scalar_lea.hbm %s535_s29, 8  ;;  %s540_s11 = scalar_lea.hbm %s774_s5, 16 }
  0x2e   : > { %p537_p6 = scmp.ne.s32.totalorder %s535_s29, %s536_s22  ;;  %p541_p0 = scmp.lt.s32.totalorder %s535_s29, %s774_s5 }
  0x2f   : > { %p542_p1 = scmp.lt.s32.totalorder %s540_s11, %s536_s22 }
  0x30   : > { %v246_v1 = vld.sshfl [vmem:[#allocation1] sm:$0xff pattern:$0x75316420]  ;;  %v247_v2 = vld.sshfl [vmem:[#allocation1 + $0x8] sm:$0xff pattern:$0x75316420]  ;;  %p538_p9 = pnand %p537_p6, %p670_p11 }
  0x31   : > { %v251_v3 = vsel %vm250_vm0, %v246_v1, 0.0  ;;  %v252_v4 = vsel %vm250_vm0, %v247_v2, 0.0  ;;  %p543_p3 = por %p542_p1, %p541_p0 }
  0x32   : > { %v253_v5 = vadd.f32 %v252_v4, %v251_v3  ;;  %p539_p13 = pneg %p538_p9 }
  0x34   : > { %254 = vadd.xlane.f32.xlu0 %v253_v5  ;;  %p544_p4 = pnand %p543_p3, %p539_p13 }
  0xa7   : > { %v255_v7 = vpop.xlane.xlu0 %254 }
  0xa8   : > { %v256_v8 = vmul.f32 0.00390625, %v255_v7 }
  0xaa   : > { %v258_v9 = vmul.f32 %v257_v6, %v256_v8 }
  0xac   : > { %v260_v10 = vsel %vm259_vm1, %v258_v9, 0.0 }
  0xad   : > { %v261_v11 = vrot.slane %v260_v10, 4 }
  0xaf   : > { %v262_v12 = vadd.f32 %v261_v11, %v260_v10 }
  0xb1   : > { %v263_v13 = vrot.slane %v262_v12, 2 }
  0xb3   : > { %v264_v14 = vadd.f32 %v263_v13, %v262_v12 }
  0xb5   : > { %v265_v15 = vrot.slane %v264_v14, 1 }
  0xb7   : > { %v266_v17 = vadd.f32 %v265_v15, %v264_v14 }
  0xb9   : > { %v268_v18 = vadd.f32 %v267_v16, %v266_v17 }
  0xbb   : > { %v423_v19 = vmul.f32 -1.442695, %v268_v18 }
  0xbd   : > { %482 = vpow2.f32 %v423_v19 }
  0xc3   : > { %v483_v20 = vpop.eup %482 }
  0xc4   : > { %v272_v21 = vadd.f32 1.0, %v483_v20 }
  0xc6   : > { %484 = vrcp.f32 %v272_v21  ;;  %v284_v25 = vand.u32 2147483648, %v272_v21  ;;  %v282_v27 = vand.u32 2147483647, %v272_v21  ;;  %vm278_vm3 = vweird.f32 %v272_v21 }
  0xc8   : > { %v285_v29 = vor.u32 1.1754944e-38, %v284_v25  ;;  %vm283_vm5 = vcmp.eq.f32.partialorder %v282_v27, 8.507059e+37 }
  0xcc   : > { %v485_v22 = vpop.eup %484 }
  0xcd   : > { %v274_v23 = vmul.f32 %v485_v22, %v272_v21  ;;  %vm279_vm2 = vweird.f32 %v485_v22 }
  0xce   : > { %vm280_vm4 = vmor %vm278_vm3, %vm279_vm2 }
  0xcf   : > { %v275_v24 = vsub.f32 1.0, %v274_v23 }
  0xd1   : > { %v276_v26 = vmul.f32 %v485_v22, %v275_v24 }
  0xd3   : > { %v277_v28 = vadd.f32 %v485_v22, %v276_v26 }
  0xd5   : > { %v281_v30 = vsel %vm280_vm4, %v485_v22, %v277_v28 }
  0xd6   : > { %v286_v31 = vsel %vm283_vm5, %v285_v29, %v281_v30 }
  0xd7   : > { %v288_v32 = vmul.f32 %v286_v31, %v268_v18 }
  0xd9   : > { %v290_v34 = vperm.slane %v288_v32, 0 }
  0xdb   : > { %v291_v35 = vmul.f32 %v290_v34, %v289_v33 }
  0xdd   : > { %v292_v36 = vsel %vm259_vm1, %v291_v35, 0.0 }
  0xde   : > { %293 = vadd.xlane.f32.xlu0 %v292_v36 }
 0x151   : > { %v294_v39 = vpop.xlane.xlu0 %293 }
 0x152   : > { %v296_v40 = vadd.f32 %v295_v38, %v294_v39 }
 0x154   : > { %v424_v41 = vmul.f32 -1.442695, %v296_v40 }
 0x156   : > { %486 = vpow2.f32 %v424_v41 }
 0x15c   : > { %v487_v42 = vpop.eup %486 }
 0x15d   : > { %v300_v43 = vadd.f32 1.0, %v487_v42 }
 0x15f   : > { %488 = vrcp.f32 %v300_v43  ;;  %v312_v47 = vand.u32 2147483648, %v300_v43  ;;  %v310_v49 = vand.u32 2147483647, %v300_v43  ;;  %vm306_vm7 = vweird.f32 %v300_v43 }
 0x161   : > { %v313_v51 = vor.u32 1.1754944e-38, %v312_v47  ;;  %vm311_vm9 = vcmp.eq.f32.partialorder %v310_v49, 8.507059e+37 }
 0x165   : > { %v489_v44 = vpop.eup %488 }
 0x166   : > { %v302_v45 = vmul.f32 %v489_v44, %v300_v43  ;;  %vm307_vm6 = vweird.f32 %v489_v44 }
 0x167   : > { %vm308_vm8 = vmor %vm306_vm7, %vm307_vm6 }
 0x168   : > { %v303_v46 = vsub.f32 1.0, %v302_v45 }
 0x16a   : > { %v304_v48 = vmul.f32 %v489_v44, %v303_v46 }
 0x16c   : > { %v305_v50 = vadd.f32 %v489_v44, %v304_v48 }
 0x16e   : > { %v309_v52 = vsel %vm308_vm8, %v489_v44, %v305_v50 }
 0x16f   : > { %v314_v53 = vsel %vm311_vm9, %v313_v51, %v309_v52 }
 0x170   : > { %318 = vperm.xlu1 %480, %v314_v53  }
 0x1e2   : > { %v319_v57 = vpop.permute.xlu1 %318 }
 0x1e3   : > { %v323_v58 = vperm.slane %v319_v57, %v322_v56 }
 0x1e5   : > { %v325_v59 = vmul.f32 %v323_v58, %v716_v0 }
 0x1e7   : > { %326 = vst [vmem:[%s242_s12] sm:$0xff] %v325_v59 }
 0x1e8   : > { %547 = shalt.err (!%p544_p4)
}
 0x1e9   : > { %434 = dma.vmem_to_hbm [thread:$0]  (%p670_p11), %s342_s14, 128, %s344_s13, %s328_s15  }
 0x1ea PF: > { %s355_s7 = sand.u32 1, %s574_s18   ;;  %p780_p7 = scmp.ge.s32.totalorder %s586_s21, 2 }
 0x1eb   : > { %s356_s26 = scalar_lea.sflag [#allocation4], %s355_s7 }
 0x1ec   : > { %p441_p5 = pnand %p780_p7, %p674_p12 }
 0x1ee   : > { %p442_p8 = pneg %p441_p5 }
 0x1f0   : > { %569 = dma.done.wait (%p442_p8), %s356_s26, 128  }
 0x1f1   : > { %571 = vsyncadd (%p442_p8), %s356_s26, 4294967168  ;;  %p18_p10 = scmp.ge.s32.totalorder %s645_s24, 4   ;;  %s781_s18 = smov %s578_s19 }
 0x1f2   : > { %s782_s19 = smov %s582_s20  ;;  %s783_s20 = smov %s657_s27 }
 0x1f3   : > { %s784_s21 = smov %s645_s24  ;;  %20 = sbr.rel (!%p18_p10) target bundleno = 5 (0x5), region = 85 }
 0x1f8   :  { %362 = vsyncpa [#allocation3], 1 }
 0x1f9   :  { %364 = vsyncpa [#allocation3 + $0x1], 1 }
 0x1fa   :  { %365 = vsyncpa [#allocation4], 1 }
 0x1fb   :  { %367 = vsyncpa [#allocation4 + $0x1], 1 }

</bundles_post_ra>
